<compile_context>
chip_gen: v5e
topology: v5e:2x2
jax: 0.10.0
libtpu: 0.0.40
codegen_flags: <defaults>
</compile_context>

<pallas_src>
import functools

import jax
import jax.numpy as jnp
from jax.experimental import pallas as pl
from jax.experimental.pallas import tpu as pltpu


# ----------------------------------------------------------------------------
# Helpers
# ----------------------------------------------------------------------------
def _round_up(x, m):
    return (x + m - 1) // m * m


def _choose_tm(M):
    """Row tile size.

    Big enough to amortize the ~0.35us per-grid-step overhead (mem-bound
    kernels only reach ~29% of HBM roofline at tile 128 vs ~85% at 512-1024),
    small enough to stay far under VMEM and to keep several grid steps so
    v7x's two TensorCores both get work.
    """
    if M <= 512:
        return M                       # single/full block (exempt from 8-mult rule)
    return min(1024, max(256, _round_up(pl.cdiv(M, 8), 8)))


# ----------------------------------------------------------------------------
# Pallas kernel: y = feats @ W^T + b  (the nn.Linear of SpiralConv)
# ----------------------------------------------------------------------------
def _spiral_linear_kernel(x_ref, wt_ref, b_ref, o_ref):
    # x_ref : (tm, K)      gathered spiral features (f32 or bf16)
    # wt_ref: (K, N_pad)   pre-transposed, 128-padded weight
    # b_ref : (1, N_pad)   f32 bias (zero in padded columns)
    # o_ref : (tm, N_pad)  lane-dense output tile
    acc = jnp.dot(x_ref[...], wt_ref[...], preferred_element_type=jnp.float32)
    o_ref[...] = (acc + b_ref[...]).astype(o_ref.dtype)


def _pallas_linear(x2d, wt, b, *, out_dtype):
    """x2d: (M, K); wt: (K, N_pad) pre-transposed/padded weight; b: (1, N_pad)."""
    M, K = x2d.shape
    K2, n_pad = wt.shape
    assert K == K2, (K, K2)

    tm = _choose_tm(M)
    grid = (pl.cdiv(M, tm),)

    # NOTE: K = in_ch*seq_length and N stay small for SpiralConv, so the whole
    # (K, N_pad) weight is kept VMEM-resident.  If K/N ever grow to the point
    # that tm*K + K*N_pad no longer fits comfortably in VMEM, add a K grid axis
    # with an f32 accumulator scratch (pl.when init/finalize) and tile N.
    cost = pl.CostEstimate(
        flops=2 * M * K * n_pad,
        transcendentals=0,
        bytes_accessed=(M * K * x2d.dtype.itemsize
                        + K * n_pad * wt.dtype.itemsize
                        + n_pad * b.dtype.itemsize
                        + M * n_pad * out_dtype.itemsize),
    )

    return pl.pallas_call(
        _spiral_linear_kernel,
        out_shape=jax.ShapeDtypeStruct((M, n_pad), out_dtype),
        grid_spec=pltpu.PrefetchScalarGridSpec(
            num_scalar_prefetch=0,
            grid=grid,
            in_specs=[
                pl.BlockSpec((tm, K), lambda i: (i, 0)),      # feature tile
                pl.BlockSpec((K, n_pad), lambda i: (0, 0)),   # full weight (resident)
                pl.BlockSpec((1, n_pad), lambda i: (0, 0)),   # bias
            ],
            out_specs=pl.BlockSpec((tm, n_pad), lambda i: (i, 0)),
        ),
        compiler_params=pltpu.CompilerParams(
            dimension_semantics=("parallel",),
            vmem_limit_bytes=32 * 1024 * 1024,
        ),
        cost_estimate=cost,
    )(x2d, wt, b)


# ----------------------------------------------------------------------------
# One-time parameter preparation (hoists transpose + pad out of the forward)
# ----------------------------------------------------------------------------
def prepare_spiral_conv_params(weight, bias, compute_dtype=jnp.float32):
    """Transpose torch-style (out_ch, K) weight to (K, N_pad) with N_pad a
    multiple of 128 (lane-dense output stores), zero-pad the bias to match.
    Use compute_dtype=jnp.bfloat16 to halve activation/weight HBM traffic on
    v5e/v6e (accumulation stays f32 inside the kernel)."""
    out_ch, K = weight.shape
    n_pad = _round_up(out_ch, 128)
    wt = jnp.zeros((K, n_pad), compute_dtype)
    wt = wt.at[:, :out_ch].set(weight.T.astype(compute_dtype))
    b = jnp.zeros((1, n_pad), jnp.float32)
    b = b.at[:, :out_ch].set(bias.astype(jnp.float32))
    return wt, b


# ----------------------------------------------------------------------------
# SpiralConv forward
# ----------------------------------------------------------------------------
@functools.partial(jax.jit, static_argnames=("out_channels", "dim"))
def spiral_conv_forward(x, indices, weight_t, bias, out_channels, dim=1):
    """
    x:            (n_nodes, in_ch) or (bs, n_nodes, in_ch)
    indices:      (n_nodes, seq_length) int32 spiral indices
    weight_t:     (in_ch*seq_length, N_pad)  from prepare_spiral_conv_params
    bias:         (1, N_pad)                 from prepare_spiral_conv_params
    out_channels: original (unpadded) number of output channels
    """
    n_nodes, _ = indices.shape
    flat_idx = indices.reshape(-1)                      # (n_nodes * seq,)
    compute_dtype = weight_t.dtype
    xc = x.astype(compute_dtype)                        # cast BEFORE the gather

    if x.ndim == 2:
        feats = jnp.take(xc, flat_idx, axis=0).reshape(n_nodes, -1)
        out = _pallas_linear(feats, weight_t, bias, out_dtype=x.dtype)
        return out[:, :out_channels]
    elif x.ndim == 3:
        if dim != 1:
            raise ValueError(
                "SpiralConv forward only supports gathering along the node "
                "axis (dim=1) for 3-D inputs; got dim={}".format(dim))
        bs = x.shape[0]
        feats = jnp.take(xc, flat_idx, axis=1).reshape(bs * n_nodes, -1)
        out = _pallas_linear(feats, weight_t, bias, out_dtype=x.dtype)
        return out.reshape(bs, n_nodes, -1)[..., :out_channels]
    else:
        raise RuntimeError(
            "x.dim() is expected to be 2 or 3, but received {}".format(x.ndim))


# ----------------------------------------------------------------------------
# Deterministic parameter init (matches reset_parameters semantics)
# ----------------------------------------------------------------------------
def init_spiral_conv_params(key, in_channels, out_channels, seq_length):
    fan_in = in_channels * seq_length
    fan_out = out_channels
    bound = (6.0 / (fan_in + fan_out)) ** 0.5           # xavier_uniform_
    weight = jax.random.uniform(key, (out_channels, fan_in),
                                minval=-bound, maxval=bound,
                                dtype=jnp.float32)
    bias = jnp.zeros((out_channels,), dtype=jnp.float32)  # constant_(bias, 0)
    return weight, bias


if __name__ == "__main__":
    key = jax.random.PRNGKey(0)
    k_x, k_idx, k_w = jax.random.split(key, 3)

    # Small shapes consistent with the module.
    bs = 2
    n_nodes = 16
    in_channels = 4
    out_channels = 32
    seq_length = 8

    x = jax.random.normal(k_x, (bs, n_nodes, in_channels), dtype=jnp.float32)
    indices = jax.random.randint(k_idx, (n_nodes, seq_length), 0, n_nodes,
                                 dtype=jnp.int32)
    weight, bias = init_spiral_conv_params(k_w, in_channels, out_channels,
                                           seq_length)

    # Plain-JAX reference (f32).
    gathered = jnp.take(x, indices.reshape(-1), axis=1).reshape(bs, n_nodes, -1)
    ref = gathered @ weight.T + bias

    # --- f32 compute path (exact semantics of the PyTorch module) -----------
    wt32, b32 = prepare_spiral_conv_params(weight, bias,
                                           compute_dtype=jnp.float32)
    out = spiral_conv_forward(x, indices, wt32, b32, out_channels, dim=1)
    jax.block_until_ready(out)
    assert out.shape == (bs, n_nodes, out_channels)
    assert jnp.allclose(out, ref, atol=1e-5, rtol=1e-5)

    # 2-D (single mesh, no batch) branch.
    x2 = x[0]
    out2 = spiral_conv_forward(x2, indices, wt32, b32, out_channels, dim=1)
    jax.block_until_ready(out2)
    ref2 = (jnp.take(x2, indices.reshape(-1), axis=0).reshape(n_nodes, -1)
            @ weight.T + bias)
    assert out2.shape == (n_nodes, out_channels)
    assert jnp.allclose(out2, ref2, atol=1e-5, rtol=1e-5)

    # --- bf16 compute path (halves gathered-tensor HBM traffic, f32 accum) --
    wt16, b16 = prepare_spiral_conv_params(weight, bias,
                                           compute_dtype=jnp.bfloat16)
    out_bf16 = spiral_conv_forward(x, indices, wt16, b16, out_channels, dim=1)
    jax.block_until_ready(out_bf16)
    assert out_bf16.shape == (bs, n_nodes, out_channels)
    assert out_bf16.dtype == x.dtype
    assert jnp.allclose(out_bf16, ref, atol=1e-1, rtol=1e-1)

    print("KERNEL_OK")
</pallas_src>

<mosaic_0001>
module attributes {stable_mosaic.version = 11 : i64} {
  func.func @_spiral_linear_kernel(%arg0: i32, %arg1: memref<32x32xf32, #tpu.memory_space<vmem>>, %arg2: memref<32x128xf32, #tpu.memory_space<vmem>>, %arg3: memref<1x128xf32, #tpu.memory_space<vmem>>, %arg4: memref<32x128xf32, #tpu.memory_space<vmem>>) attributes {dimension_semantics = [#tpu.dimension_semantics<parallel>], iteration_bounds = array<i64: 1>, scalar_prefetch = 0 : i64, scratch_operands = 0 : i64, tpu.core_type = #tpu.core_type<tc>, window_params = [{transform_indices = @transform_0, window_bounds = array<i64: 32, 32>}, {pipeline_mode = #tpu.pipeline_mode<synchronous>, transform_indices = @transform_1, window_bounds = array<i64: 32, 128>}, {pipeline_mode = #tpu.pipeline_mode<synchronous>, transform_indices = @transform_2, window_bounds = array<i64: 1, 128>}, {transform_indices = @transform_3, window_bounds = array<i64: 32, 128>}]} {
    %c0 = arith.constant 0 : index
    %c0_0 = arith.constant 0 : index
    %0 = vector.load %arg1[%c0, %c0_0] : memref<32x32xf32, #tpu.memory_space<vmem>>, vector<32x32xf32>
    %c0_1 = arith.constant 0 : index
    %c0_2 = arith.constant 0 : index
    %1 = vector.load %arg2[%c0_1, %c0_2] : memref<32x128xf32, #tpu.memory_space<vmem>>, vector<32x128xf32>
    %cst = arith.constant dense<0.000000e+00> : vector<32x128xf32>
    %2 = tpu.matmul %0, %1, %cst {dimension_numbers = #tpu.dot_dimension_numbers<[1], [0], [0], [1], [0, 0, 1, 1], [], []>} : vector<32x32xf32>, vector<32x128xf32>, vector<32x128xf32> -> vector<32x128xf32>
    %c0_3 = arith.constant 0 : index
    %c0_4 = arith.constant 0 : index
    %3 = vector.load %arg3[%c0_3, %c0_4] : memref<1x128xf32, #tpu.memory_space<vmem>>, vector<1x128xf32>
    %4 = vector.broadcast %3 : vector<1x128xf32> to vector<32x128xf32>
    %5 = arith.addf %2, %4 : vector<32x128xf32>
    %c0_5 = arith.constant 0 : index
    %c0_6 = arith.constant 0 : index
    %6 = vector.load %arg4[%c0_5, %c0_6] : memref<32x128xf32, #tpu.memory_space<vmem>>, vector<32x128xf32>
    tpu.vector_store %arg4[%c0_5, %c0_6], %5 {strides = array<i32>} : memref<32x128xf32, #tpu.memory_space<vmem>>, vector<32x128xf32>,
    return
  }
  func.func @transform_0(%arg0: i32) -> (i32, i32) {
    %c0_i32 = arith.constant 0 : i32
    %c0_i32_0 = arith.constant 0 : i32
    return %arg0, %c0_i32 : i32, i32
  }
  func.func @transform_1(%arg0: i32) -> (i32, i32) {
    %c0_i32 = arith.constant 0 : i32
    %c0_i32_0 = arith.constant 0 : i32
    %c0_i32_1 = arith.constant 0 : i32
    return %c0_i32, %c0_i32_0 : i32, i32
  }
  func.func @transform_2(%arg0: i32) -> (i32, i32) {
    %c0_i32 = arith.constant 0 : i32
    %c0_i32_0 = arith.constant 0 : i32
    %c0_i32_1 = arith.constant 0 : i32
    return %c0_i32, %c0_i32_0 : i32, i32
  }
  func.func @transform_3(%arg0: i32) -> (i32, i32) {
    %c0_i32 = arith.constant 0 : i32
    %c0_i32_0 = arith.constant 0 : i32
    return %arg0, %c0_i32 : i32, i32
  }
}

</mosaic_0001>

<bundles_post_ra>
// kernel: spiral_conv_forward.1
= control target key start
LH: loop header
LB: loop body
LE: loop exit
PB: predicated region body
PF: predicated region fallthrough
CT: control target
= control target key end

     0   :  { %s190_s0 = inlined_call_operand.vmem [shape: f32[32,32], index: 0, kind: input, shape index: {}]   ;;  %s191_s1 = inlined_call_operand.vmem [shape: f32[32,128], index: 1, kind: input, shape index: {}]   ;;  %s192_s2 = inlined_call_operand.vmem [shape: f32[1,128], index: 2, kind: input, shape index: {}]   ;;  %s193_s3 = inlined_call_operand.hbm [shape: f32[32,128], index: 3, kind: output, shape index: {}]  }
   0x1   :  { %v22_v0 = vld [vmem:[%s191_s1 + $0x18] sm:$0xff]  ;;  %v21_v1 = vld [vmem:[%s191_s1 + $0x10] sm:$0xff]  ;;  %v20_v2 = vld [vmem:[%s191_s1 + $0x8] sm:$0xff] }
   0x2   :  { %96 = vmatpush.msra.mxu2 %v22_v0  ;;  %97 = vmatpush.msra.mxu3 %v22_v0 }
   0x3   :  { %52 = vmatpush.msra.mxu0 %v22_v0  ;;  %95 = vmatpush.msra.mxu1 %v22_v0 }
   0x4   :  { %99 = vmatpush.msra.mxu2 %v21_v1  ;;  %100 = vmatpush.msra.mxu3 %v21_v1 }
   0x5   :  { %8 = vsyncpa [#allocation3], 0  ;;  %v19_v3 = vld [vmem:[%s191_s1] sm:$0xff]  ;;  %53 = vmatpush.msra.mxu0 %v21_v1  ;;  %98 = vmatpush.msra.mxu1 %v21_v1  ;;  %v17_v4 = vld [vmem:[%s190_s0 + $0x10] sm:$0xff]  ;;  %vm27_vm0 = vcmask 261120   ;;  %s137_s29 = smov [#allocation2]  }
   0x6   :  { %102 = vmatpush.msra.mxu2 %v20_v2  ;;  %103 = vmatpush.msra.mxu3 %v20_v2  ;;  %v18_v5 = vld [vmem:[%s190_s0 + $0x18] sm:$0xff]  ;;  %v15_v6 = vld [vmem:[%s190_s0] sm:$0xff]  ;;  %v16_v7 = vld [vmem:[%s190_s0 + $0x8] sm:$0xff]  ;;  %s77_s30 = sshll.u32 %s137_s29, 4  ;;  %s79_s0 = sshll.u32 %s193_s3, 4  ;;  %s78_s30 = int_to_ptr.vmem [resolvable:$true] %s77_s30  ;;  %s80_s0 = int_to_ptr.hbm [resolvable:$true] %s79_s0 }
   0x7   :  { %54 = vmatpush.msra.mxu0 %v20_v2  ;;  %101 = vmatpush.msra.mxu1 %v20_v2  ;;  %v110_v8 = vld [vmem:[%s192_s2] ss:$0 sm:$0xff]  ;;  %s138_s2 = smov 128   ;;  %s139_s6 = smov 8  }
   0x8   :  { %105 = vmatpush.msra.mxu2 %v19_v3  ;;  %106 = vmatpush.msra.mxu3 %v19_v3 }
   0x9   :  { %93 = vmatmul.msk.f32.vlgmr.msra.gmra.mxu2 %vm27_vm0, %v17_v4  ;;  %94 = vmatmul.msk.f32.vlgmr.msra.gmra.mxu3 %vm27_vm0, %v18_v5 }
   0xa   :  { %55 = vmatpush.msra.mxu0 %v19_v3  ;;  %104 = vmatpush.msra.mxu1 %v19_v3 }
   0xb   :  { %91 = vmatmul.msk.f32.vlgmr.msra.gmra.mxu0 %vm27_vm0, %v15_v6  ;;  %92 = vmatmul.msk.f32.vlgmr.msra.gmra.mxu1 %vm27_vm0, %v16_v7 }
  0x88   :  { %v57_v9 = vpop.f32.mrf.mxu0  ;;  %v60_v10 = vpop.f32.mrf.mxu1 }
  0x89   :  { %v58_v11 = vadd.f32 %v110_v8, %v57_v9  ;;  %v61_v12 = vadd.f32 %v110_v8, %v60_v10 }
  0x8b   :  { %69 = vst [vmem:[#allocation2] sm:$0xff] %v58_v11 }
  0x8c   :  { %70 = vst [vmem:[#allocation2 + $0x8] sm:$0xff] %v61_v12  ;;  %v63_v13 = vpop.f32.mrf.mxu2  ;;  %v66_v14 = vpop.f32.mrf.mxu3 }
  0x8d   :  { %v64_v15 = vadd.f32 %v110_v8, %v63_v13  ;;  %v67_v16 = vadd.f32 %v110_v8, %v66_v14 }
  0x8f   :  { %71 = vst [vmem:[#allocation2 + $0x10] sm:$0xff] %v64_v15 }
  0x90   :  { %72 = vst [vmem:[#allocation2 + $0x18] sm:$0xff] %v67_v16 }
  0x91   :  { %85 = dma.vmem_to_hbm [thread:$0]  %s78_s30, 512, %s80_s0, [#allocation3], %s138_s2, %s138_s2, %s139_s6  }
  0x92   :  { %135 = dma.done.wait [#allocation3], 512  }
  0x93   :  { %136 = vsyncadd [#allocation3], 4294966784 }
  0x94   :  { %90 = vsyncpa [#allocation3], 1 }

</bundles_post_ra>
